<compile_context>
chip_gen: v6e
topology: v6e:2x2x1
jax: 0.10.0
libtpu: 0.0.40
codegen_flags: <defaults>
</compile_context>

<pallas_src>
import jax
import jax.numpy as jnp
from jax.experimental import pallas as pl
from jax.experimental.pallas import tpu as pltpu

_LANE = 128
_SUBLANE = 8


def _round_up(n: int, m: int) -> int:
    return ((n + m - 1) // m) * m


def _pad_dim(d: int) -> int:
    """Pad a feature dim to 128 lanes; widths >128 round up to a multiple of 256
    so the 256x256 MXU on v6e/v7x is not half idle (v5e is fine with 128)."""
    p = _round_up(d, _LANE)
    if p > _LANE and p % 256 != 0:
        p = _round_up(p, 256)
    return p


def _vmem_cap_bytes() -> int:
    """85% of this generation's per-core VMEM; conservative fallback 48 MiB."""
    try:
        info = pltpu.get_tpu_info()
        cap = getattr(info, "vmem_capacity_bytes", None)
        if cap:
            return int(0.85 * int(cap))
    except Exception:
        pass
    return 48 * 2**20


def _make_mlp_kernel(num_layers, use_batchnorm, dims_pad, vec_rows):
    """Fused-MLP kernel body.

    Refs (in order): x_ref, w_0 .. w_{L-1}, vecs_ref, out_ref
      - each w is pre-transposed to (in_pad, out_pad), lane-padded
      - vecs_ref is one f32 (n_rows, max_pad) slab holding all biases and
        (optionally) BN gammas/betas, rows addressed via `vec_rows`.
    """

    def kernel(*refs):
        x_ref = refs[0]
        w_refs = refs[1:1 + num_layers]
        vecs_ref = refs[1 + num_layers]
        out_ref = refs[-1]

        x = x_ref[...]
        for li in range(num_layers):
            p_out = dims_pad[li + 1]
            w = w_refs[li][...]                        # (in_pad, out_pad)
            # Feed the MXU in the weight dtype (bf16 x bf16 when param_dtype=bf16);
            # accumulation is always f32.
            y = jnp.dot(x.astype(w.dtype), w, preferred_element_type=jnp.float32)
            b_row = vec_rows[("b", li)]
            y = y + vecs_ref[b_row:b_row + 1, :p_out]  # f32 bias

            if li != num_layers - 1:
                if use_batchnorm:
                    g_row = vec_rows[("g", li)]
                    bb_row = vec_rows[("bb", li)]
                    gamma = vecs_ref[g_row:g_row + 1, :p_out]
                    beta = vecs_ref[bb_row:bb_row + 1, :p_out]
                    # Training-mode batch norm (running stats = None), biased
                    # variance, eps=1e-5.  Whole (unpadded) batch is resident in
                    # this tile -- enforced by the wrapper.
                    mean = jnp.mean(y, axis=0, keepdims=True)
                    var = jnp.mean((y - mean) * (y - mean), axis=0, keepdims=True)
                    y = (y - mean) * jax.lax.rsqrt(var + 1e-5) * gamma + beta
                y = jnp.maximum(y, 0.0)                # relu
            x = y

        out_ref[...] = x.astype(out_ref.dtype)

    return kernel


def functional_fc_net_forward(x, weights, biases, bn_weights=None, bn_biases=None,
                              use_batchnorm=False, batch_tile=1024,
                              param_dtype=jnp.float32):
    """Whole-MLP forward in one fused, batch-gridded Pallas call.

    x:        (batch, num_inputs) float32
    weights:  list of (out_i, in_i) float32   (torch.nn.functional.linear layout)
    biases:   list of (out_i,) float32
    param_dtype: weight storage / activation streaming dtype (bf16 recommended
                 on v6e/v7x); matmul accumulation is always f32, biases & BN
                 params always stay f32.
    """
    num_layers = len(weights)
    batch, num_inputs = x.shape
    num_outputs = int(weights[-1].shape[0])

    # ---- padded layer widths ---------------------------------------------------
    dims = [num_inputs] + [int(w.shape[0]) for w in weights]
    dims_pad = [_pad_dim(d) for d in dims]
    in_pad, out_pad = dims_pad[0], dims_pad[-1]
    max_pad = max(dims_pad)

    is_f32_params = jnp.dtype(param_dtype) == jnp.dtype(jnp.float32)
    io_dtype = jnp.float32 if is_f32_params else jnp.dtype(param_dtype)
    out_dtype = jnp.float32
    io_itemsize = jnp.dtype(io_dtype).itemsize
    w_itemsize = jnp.dtype(param_dtype).itemsize

    # ---- batch tiling ------------------------------------------------------------
    if use_batchnorm:
        tile_b = _round_up(batch, _SUBLANE)
    else:
        tile_b = min(_round_up(batch, _SUBLANE), _round_up(batch_tile, _SUBLANE))
        # v7x megacore: ensure >=2 grid steps whenever the batch allows it so both
        # TensorCores get work under dimension_semantics=("parallel",).
        if batch >= 2 * _SUBLANE and _round_up(batch, tile_b) // tile_b < 2:
            tile_b = _round_up((batch + 1) // 2, _SUBLANE)

    # ---- coalesced bias/BN slab row layout --------------------------------------
    vec_rows = {}
    row = 0
    for li in range(num_layers):
        vec_rows[("b", li)] = row
        row += 1
        if use_batchnorm and li != num_layers - 1:
            vec_rows[("g", li)] = row
            row += 1
            vec_rows[("bb", li)] = row
            row += 1
    n_rows = row

    # ---- VMEM budget: single-buffered residents + streamed tiles + intermediates -
    weight_bytes = sum(dims_pad[i] * dims_pad[i + 1] for i in range(num_layers)) * w_itemsize
    vec_bytes = _round_up(n_rows, _SUBLANE) * max_pad * 4
    resident_bytes = weight_bytes + vec_bytes

    def vmem_need(tb):
        io = 2 * tb * (in_pad * io_itemsize + out_pad * jnp.dtype(out_dtype).itemsize)
        inter = 2 * tb * max_pad * 4          # live matmul input + output (f32)
        return resident_bytes + io + inter

    vmem_cap = _vmem_cap_bytes()
    if not use_batchnorm:
        while vmem_need(tile_b) > vmem_cap and tile_b > _SUBLANE:
            tile_b = max(_SUBLANE, _round_up(tile_b // 2, _SUBLANE))

    batch_pad = _round_up(batch, tile_b)
    num_tiles = batch_pad // tile_b

    if use_batchnorm and (num_tiles != 1 or batch_pad != batch):
        # TODO(synk): cross-tile batch-norm stats would need a separate stats pass.
        raise ValueError("use_batchnorm=True requires the whole (unpadded) batch "
                         "to fit in a single batch tile.")

    vmem_limit = int(min(max(int(1.5 * vmem_need(tile_b)), 32 * 2**20), vmem_cap))

    # ---- pack operands -----------------------------------------------------------
    if batch_pad == batch and in_pad == num_inputs:
        x_p = x.astype(io_dtype)              # already aligned: skip host-side pad copy
    else:
        x_p = jnp.zeros((batch_pad, in_pad), io_dtype).at[:batch, :num_inputs].set(
            x.astype(io_dtype))

    w_ops = []
    for li in range(num_layers):
        d_in, d_out = dims[li], dims[li + 1]
        p_in, p_out = dims_pad[li], dims_pad[li + 1]
        wt = jnp.zeros((p_in, p_out), param_dtype).at[:d_in, :d_out].set(
            weights[li].T.astype(param_dtype))         # store W^T, lane-padded
        w_ops.append(wt)

    vecs = jnp.zeros((n_rows, max_pad), jnp.float32)   # biases / BN params stay f32
    for li in range(num_layers):
        d_out = dims[li + 1]
        vecs = vecs.at[vec_rows[("b", li)], :d_out].set(biases[li].astype(jnp.float32))
        if use_batchnorm and li != num_layers - 1:
            vecs = vecs.at[vec_rows[("g", li)], :d_out].set(bn_weights[li].astype(jnp.float32))
            vecs = vecs.at[vec_rows[("bb", li)], :d_out].set(bn_biases[li].astype(jnp.float32))

    operands = [x_p] + w_ops + [vecs]
    kernel = _make_mlp_kernel(num_layers, use_batchnorm, dims_pad, vec_rows)

    # ---- build the pallas_call ----------------------------------------------------
    def build(single_buffer_params):
        def resident_spec(shape):
            # Constant block index -> stays resident in VMEM across all grid steps;
            # single-buffer it so it does not reserve 2x its size.
            if single_buffer_params:
                return pl.BlockSpec(shape, lambda i: (0, 0),
                                    pipeline_mode=pl.Buffered(1))
            return pl.BlockSpec(shape, lambda i: (0, 0))

        in_specs = [pl.BlockSpec((tile_b, in_pad), lambda i: (i, 0))]
        in_specs += [resident_spec((dims_pad[li], dims_pad[li + 1]))
                     for li in range(num_layers)]
        in_specs += [resident_spec((n_rows, max_pad))]
        out_spec = pl.BlockSpec((tile_b, out_pad), lambda i: (i, 0))

        return pl.pallas_call(
            kernel,
            out_shape=jax.ShapeDtypeStruct((batch_pad, out_pad), out_dtype),
            grid=(num_tiles,),
            in_specs=in_specs,
            out_specs=out_spec,
            compiler_params=pltpu.CompilerParams(
                dimension_semantics=("parallel",),
                vmem_limit_bytes=vmem_limit),
        )

    try:
        out_p = build(True)(*operands)
    except Exception:
        # Fallback: default double-buffered resident params.
        out_p = build(False)(*operands)

    return out_p[:batch, :num_outputs]


def init_params(key, num_inputs, hidden_dims, num_outputs):
    """Deterministic parameter init mirroring the torch module's __init__.

    kaiming_normal_ on (out, in) weights -> std = sqrt(2 / fan_in); biases zero.
    """
    weights, biases = [], []
    prev = num_inputs
    dims = list(hidden_dims) + [num_outputs]
    for d in dims:
        key, sub = jax.random.split(key)
        std = jnp.sqrt(2.0 / prev)
        weights.append(jax.random.normal(sub, (d, prev), jnp.float32) * std)
        biases.append(jnp.zeros((d,), jnp.float32))
        prev = d
    return weights, biases


def reference_forward(x, weights, biases):
    """Pure-JAX reference (no batchnorm)."""
    num_layers = len(weights)
    for i in range(num_layers):
        x = x @ weights[i].T + biases[i][None, :]
        if i != num_layers - 1:
            x = jnp.maximum(x, 0.0)
    return x


def reference_forward_bn(x, weights, biases, bn_w, bn_b):
    """Pure-JAX reference with training-mode batch norm (matches torch F.batch_norm)."""
    num_layers = len(weights)
    for i in range(num_layers):
        x = x @ weights[i].T + biases[i][None, :]
        if i != num_layers - 1:
            m = jnp.mean(x, axis=0, keepdims=True)
            v = jnp.mean((x - m) * (x - m), axis=0, keepdims=True)
            x = (x - m) / jnp.sqrt(v + 1e-5) * bn_w[i][None, :] + bn_b[i][None, :]
            x = jnp.maximum(x, 0.0)
    return x


if __name__ == "__main__":
    # Small, module-consistent shapes.  At these toy sizes the call is
    # launch-overhead-bound; the kernel is structured (padding, batch grid,
    # resident single-buffered weights, bf16 MXU path) so it scales to realistic
    # batch / width as well.
    batch = 8
    num_inputs = 16
    hidden_dims = (32, 32)
    num_outputs = 8

    key = jax.random.PRNGKey(0)
    key, xkey = jax.random.split(key)
    x = jax.random.normal(xkey, (batch, num_inputs), jnp.float32)

    weights, biases = init_params(key, num_inputs, hidden_dims, num_outputs)

    # 1) Default config (USE_BATCHNORM=False), f32 params.
    out = functional_fc_net_forward(x, weights, biases, use_batchnorm=False)
    out = jax.block_until_ready(out)
    ref = reference_forward(x, weights, biases)
    assert out.shape == (batch, num_outputs)
    assert jnp.allclose(out, ref, atol=1e-5, rtol=1e-5), "f32 mismatch vs reference"

    # 2) bf16 weight storage + bf16 activation streaming (f32 accumulate).
    out_bf16 = functional_fc_net_forward(x, weights, biases, use_batchnorm=False,
                                         param_dtype=jnp.bfloat16)
    out_bf16 = jax.block_until_ready(out_bf16)
    assert jnp.allclose(out_bf16, ref, atol=1e-1, rtol=1e-1), "bf16 mismatch vs reference"

    # 3) Training-mode batch norm path (single-tile batch).
    bn_w, bn_b = [], []
    for d in hidden_dims:
        key, k1, k2 = jax.random.split(key, 3)
        bn_w.append(1.0 + 0.1 * jax.random.normal(k1, (d,), jnp.float32))
        bn_b.append(0.1 * jax.random.normal(k2, (d,), jnp.float32))
    out_bn = functional_fc_net_forward(x, weights, biases,
                                       bn_weights=bn_w, bn_biases=bn_b,
                                       use_batchnorm=True)
    out_bn = jax.block_until_ready(out_bn)
    ref_bn = reference_forward_bn(x, weights, biases, bn_w, bn_b)
    assert jnp.allclose(out_bn, ref_bn, atol=1e-4, rtol=1e-4), "batchnorm mismatch"

    print("KERNEL_OK")
</pallas_src>

<mosaic_0001>
module attributes {stable_mosaic.version = 11 : i64} {
  func.func @kernel(%arg0: i32, %arg1: memref<8x128xf32, #tpu.memory_space<vmem>>, %arg2: memref<128x128xf32, #tpu.memory_space<vmem>>, %arg3: memref<128x128xf32, #tpu.memory_space<vmem>>, %arg4: memref<128x128xf32, #tpu.memory_space<vmem>>, %arg5: memref<3x128xf32, #tpu.memory_space<vmem>>, %arg6: memref<8x128xf32, #tpu.memory_space<vmem>>) attributes {dimension_semantics = [#tpu.dimension_semantics<parallel>], iteration_bounds = array<i64: 1>, scalar_prefetch = 0 : i64, scratch_operands = 0 : i64, tpu.core_type = #tpu.core_type<tc>, window_params = [{transform_indices = @transform_0, window_bounds = array<i64: 8, 128>}, {pipeline_mode = #tpu.pipeline_mode<synchronous>, transform_indices = @transform_1, window_bounds = array<i64: 128, 128>}, {pipeline_mode = #tpu.pipeline_mode<synchronous>, transform_indices = @transform_2, window_bounds = array<i64: 128, 128>}, {pipeline_mode = #tpu.pipeline_mode<synchronous>, transform_indices = @transform_3, window_bounds = array<i64: 128, 128>}, {pipeline_mode = #tpu.pipeline_mode<synchronous>, transform_indices = @transform_4, window_bounds = array<i64: 3, 128>}, {transform_indices = @transform_5, window_bounds = array<i64: 8, 128>}]} {
    %c0 = arith.constant 0 : index
    %c0_0 = arith.constant 0 : index
    %0 = vector.load %arg1[%c0, %c0_0] : memref<8x128xf32, #tpu.memory_space<vmem>>, vector<8x128xf32>
    %c0_1 = arith.constant 0 : index
    %c0_2 = arith.constant 0 : index
    %1 = vector.load %arg2[%c0_1, %c0_2] : memref<128x128xf32, #tpu.memory_space<vmem>>, vector<128x128xf32>
    %cst = arith.constant dense<0.000000e+00> : vector<8x128xf32>
    %2 = tpu.matmul %0, %1, %cst {dimension_numbers = #tpu.dot_dimension_numbers<[1], [0], [0], [1], [0, 0, 1, 1], [], []>} : vector<8x128xf32>, vector<128x128xf32>, vector<8x128xf32> -> vector<8x128xf32>
    %c0_3 = arith.constant 0 : index
    %c0_4 = arith.constant 0 : index
    %3 = vector.load %arg5[%c0_3, %c0_4] : memref<3x128xf32, #tpu.memory_space<vmem>>, vector<1x128xf32>
    %4 = vector.broadcast %3 : vector<1x128xf32> to vector<8x128xf32>
    %5 = arith.addf %2, %4 : vector<8x128xf32>
    %cst_5 = arith.constant 0.000000e+00 : f32
    %6 = vector.broadcast %cst_5 : f32 to vector<8x128xf32>
    %7 = arith.maximumf %5, %6 : vector<8x128xf32>
    %c0_6 = arith.constant 0 : index
    %c0_7 = arith.constant 0 : index
    %8 = vector.load %arg3[%c0_6, %c0_7] : memref<128x128xf32, #tpu.memory_space<vmem>>, vector<128x128xf32>
    %cst_8 = arith.constant dense<0.000000e+00> : vector<8x128xf32>
    %9 = tpu.matmul %7, %8, %cst_8 {dimension_numbers = #tpu.dot_dimension_numbers<[1], [0], [0], [1], [0, 0, 1, 1], [], []>} : vector<8x128xf32>, vector<128x128xf32>, vector<8x128xf32> -> vector<8x128xf32>
    %c1 = arith.constant 1 : index
    %c0_9 = arith.constant 0 : index
    %10 = vector.load %arg5[%c1, %c0_9] : memref<3x128xf32, #tpu.memory_space<vmem>>, vector<1x128xf32>
    %11 = vector.broadcast %10 : vector<1x128xf32> to vector<8x128xf32>
    %12 = arith.addf %9, %11 : vector<8x128xf32>
    %cst_10 = arith.constant 0.000000e+00 : f32
    %13 = vector.broadcast %cst_10 : f32 to vector<8x128xf32>
    %14 = arith.maximumf %12, %13 : vector<8x128xf32>
    %c0_11 = arith.constant 0 : index
    %c0_12 = arith.constant 0 : index
    %15 = vector.load %arg4[%c0_11, %c0_12] : memref<128x128xf32, #tpu.memory_space<vmem>>, vector<128x128xf32>
    %cst_13 = arith.constant dense<0.000000e+00> : vector<8x128xf32>
    %16 = tpu.matmul %14, %15, %cst_13 {dimension_numbers = #tpu.dot_dimension_numbers<[1], [0], [0], [1], [0, 0, 1, 1], [], []>} : vector<8x128xf32>, vector<128x128xf32>, vector<8x128xf32> -> vector<8x128xf32>
    %c2 = arith.constant 2 : index
    %c0_14 = arith.constant 0 : index
    %17 = vector.load %arg5[%c2, %c0_14] : memref<3x128xf32, #tpu.memory_space<vmem>>, vector<1x128xf32>
    %18 = vector.broadcast %17 : vector<1x128xf32> to vector<8x128xf32>
    %19 = arith.addf %16, %18 : vector<8x128xf32>
    %c0_15 = arith.constant 0 : index
    %c0_16 = arith.constant 0 : index
    %20 = vector.load %arg6[%c0_15, %c0_16] : memref<8x128xf32, #tpu.memory_space<vmem>>, vector<8x128xf32>
    tpu.vector_store %arg6[%c0_15, %c0_16], %19 {strides = array<i32>} : memref<8x128xf32, #tpu.memory_space<vmem>>, vector<8x128xf32>,
    return
  }
  func.func @transform_0(%arg0: i32) -> (i32, i32) {
    %c0_i32 = arith.constant 0 : i32
    %c0_i32_0 = arith.constant 0 : i32
    return %arg0, %c0_i32 : i32, i32
  }
  func.func @transform_1(%arg0: i32) -> (i32, i32) {
    %c0_i32 = arith.constant 0 : i32
    %c0_i32_0 = arith.constant 0 : i32
    %c0_i32_1 = arith.constant 0 : i32
    return %c0_i32, %c0_i32_0 : i32, i32
  }
  func.func @transform_2(%arg0: i32) -> (i32, i32) {
    %c0_i32 = arith.constant 0 : i32
    %c0_i32_0 = arith.constant 0 : i32
    %c0_i32_1 = arith.constant 0 : i32
    return %c0_i32, %c0_i32_0 : i32, i32
  }
  func.func @transform_3(%arg0: i32) -> (i32, i32) {
    %c0_i32 = arith.constant 0 : i32
    %c0_i32_0 = arith.constant 0 : i32
    %c0_i32_1 = arith.constant 0 : i32
    return %c0_i32, %c0_i32_0 : i32, i32
  }
  func.func @transform_4(%arg0: i32) -> (i32, i32) {
    %c0_i32 = arith.constant 0 : i32
    %c0_i32_0 = arith.constant 0 : i32
    %c0_i32_1 = arith.constant 0 : i32
    return %c0_i32, %c0_i32_0 : i32, i32
  }
  func.func @transform_5(%arg0: i32) -> (i32, i32) {
    %c0_i32 = arith.constant 0 : i32
    %c0_i32_0 = arith.constant 0 : i32
    return %arg0, %c0_i32 : i32, i32
  }
}

module attributes {stable_mosaic.version = 11 : i64} {
  func.func @kernel(%arg0: i32, %arg1: memref<8x128xf32, #tpu.memory_space<vmem>>, %arg2: memref<128x128xf32, #tpu.memory_space<vmem>>, %arg3: memref<128x128xf32, #tpu.memory_space<vmem>>, %arg4: memref<128x128xf32, #tpu.memory_space<vmem>>, %arg5: memref<3x128xf32, #tpu.memory_space<vmem>>, %arg6: memref<8x128xf32, #tpu.memory_space<vmem>>) attributes {dimension_semantics = [#tpu.dimension_semantics<parallel>], iteration_bounds = array<i64: 1>, scalar_prefetch = 0 : i64, scratch_operands = 0 : i64, tpu.core_type = #tpu.core_type<tc>, window_params = [{transform_indices = @transform_0, window_bounds = array<i64: 8, 128>}, {pipeline_mode = #tpu.pipeline_mode<synchronous>, transform_indices = @transform_1, window_bounds = array<i64: 128, 128>}, {pipeline_mode = #tpu.pipeline_mode<synchronous>, transform_indices = @transform_2, window_bounds = array<i64: 128, 128>}, {pipeline_mode = #tpu.pipeline_mode<synchronous>, transform_indices = @transform_3, window_bounds = array<i64: 128, 128>}, {pipeline_mode = #tpu.pipeline_mode<synchronous>, transform_indices = @transform_4, window_bounds = array<i64: 3, 128>}, {transform_indices = @transform_5, window_bounds = array<i64: 8, 128>}]} {
    %c0 = arith.constant 0 : index
    %c0_0 = arith.constant 0 : index
    %0 = vector.load %arg1[%c0, %c0_0] : memref<8x128xf32, #tpu.memory_space<vmem>>, vector<8x128xf32>
    %c0_1 = arith.constant 0 : index
    %c0_2 = arith.constant 0 : index
    %1 = vector.load %arg2[%c0_1, %c0_2] : memref<128x128xf32, #tpu.memory_space<vmem>>, vector<128x128xf32>
    %cst = arith.constant dense<0.000000e+00> : vector<8x128xf32>
    %2 = tpu.matmul %0, %1, %cst {dimension_numbers = #tpu.dot_dimension_numbers<[1], [0], [0], [1], [0, 0, 1, 1], [], []>} : vector<8x128xf32>, vector<128x128xf32>, vector<8x128xf32> -> vector<8x128xf32>
    %c0_3 = arith.constant 0 : index
    %c0_4 = arith.constant 0 : index
    %3 = vector.load %arg5[%c0_3, %c0_4] : memref<3x128xf32, #tpu.memory_space<vmem>>, vector<1x128xf32>
    %4 = vector.broadcast %3 : vector<1x128xf32> to vector<8x128xf32>
    %5 = arith.addf %2, %4 : vector<8x128xf32>
    %cst_5 = arith.constant 0.000000e+00 : f32
    %6 = vector.broadcast %cst_5 : f32 to vector<8x128xf32>
    %7 = arith.maximumf %5, %6 : vector<8x128xf32>
    %c0_6 = arith.constant 0 : index
    %c0_7 = arith.constant 0 : index
    %8 = vector.load %arg3[%c0_6, %c0_7] : memref<128x128xf32, #tpu.memory_space<vmem>>, vector<128x128xf32>
    %cst_8 = arith.constant dense<0.000000e+00> : vector<8x128xf32>
    %9 = tpu.matmul %7, %8, %cst_8 {dimension_numbers = #tpu.dot_dimension_numbers<[1], [0], [0], [1], [0, 0, 1, 1], [], []>} : vector<8x128xf32>, vector<128x128xf32>, vector<8x128xf32> -> vector<8x128xf32>
    %c1 = arith.constant 1 : index
    %c0_9 = arith.constant 0 : index
    %10 = vector.load %arg5[%c1, %c0_9] : memref<3x128xf32, #tpu.memory_space<vmem>>, vector<1x128xf32>
    %11 = vector.broadcast %10 : vector<1x128xf32> to vector<8x128xf32>
    %12 = arith.addf %9, %11 : vector<8x128xf32>
    %cst_10 = arith.constant 0.000000e+00 : f32
    %13 = vector.broadcast %cst_10 : f32 to vector<8x128xf32>
    %14 = arith.maximumf %12, %13 : vector<8x128xf32>
    %c0_11 = arith.constant 0 : index
    %c0_12 = arith.constant 0 : index
    %15 = vector.load %arg4[%c0_11, %c0_12] : memref<128x128xf32, #tpu.memory_space<vmem>>, vector<128x128xf32>
    %cst_13 = arith.constant dense<0.000000e+00> : vector<8x128xf32>
    %16 = tpu.matmul %14, %15, %cst_13 {dimension_numbers = #tpu.dot_dimension_numbers<[1], [0], [0], [1], [0, 0, 1, 1], [], []>} : vector<8x128xf32>, vector<128x128xf32>, vector<8x128xf32> -> vector<8x128xf32>
    %c2 = arith.constant 2 : index
    %c0_14 = arith.constant 0 : index
    %17 = vector.load %arg5[%c2, %c0_14] : memref<3x128xf32, #tpu.memory_space<vmem>>, vector<1x128xf32>
    %18 = vector.broadcast %17 : vector<1x128xf32> to vector<8x128xf32>
    %19 = arith.addf %16, %18 : vector<8x128xf32>
    %c0_15 = arith.constant 0 : index
    %c0_16 = arith.constant 0 : index
    %20 = vector.load %arg6[%c0_15, %c0_16] : memref<8x128xf32, #tpu.memory_space<vmem>>, vector<8x128xf32>
    tpu.vector_store %arg6[%c0_15, %c0_16], %19 {strides = array<i32>} : memref<8x128xf32, #tpu.memory_space<vmem>>, vector<8x128xf32>,
    return
  }
  func.func @transform_0(%arg0: i32) -> (i32, i32) {
    %c0_i32 = arith.constant 0 : i32
    %c0_i32_0 = arith.constant 0 : i32
    return %arg0, %c0_i32 : i32, i32
  }
  func.func @transform_1(%arg0: i32) -> (i32, i32) {
    %c0_i32 = arith.constant 0 : i32
    %c0_i32_0 = arith.constant 0 : i32
    %c0_i32_1 = arith.constant 0 : i32
    return %c0_i32, %c0_i32_0 : i32, i32
  }
  func.func @transform_2(%arg0: i32) -> (i32, i32) {
    %c0_i32 = arith.constant 0 : i32
    %c0_i32_0 = arith.constant 0 : i32
    %c0_i32_1 = arith.constant 0 : i32
    return %c0_i32, %c0_i32_0 : i32, i32
  }
  func.func @transform_3(%arg0: i32) -> (i32, i32) {
    %c0_i32 = arith.constant 0 : i32
    %c0_i32_0 = arith.constant 0 : i32
    %c0_i32_1 = arith.constant 0 : i32
    return %c0_i32, %c0_i32_0 : i32, i32
  }
  func.func @transform_4(%arg0: i32) -> (i32, i32) {
    %c0_i32 = arith.constant 0 : i32
    %c0_i32_0 = arith.constant 0 : i32
    %c0_i32_1 = arith.constant 0 : i32
    return %c0_i32, %c0_i32_0 : i32, i32
  }
  func.func @transform_5(%arg0: i32) -> (i32, i32) {
    %c0_i32 = arith.constant 0 : i32
    %c0_i32_0 = arith.constant 0 : i32
    return %arg0, %c0_i32 : i32, i32
  }
}

</mosaic_0001>

<bundles_post_ra>
// kernel: tpu_custom_call.1
= control target key start
LH: loop header
LB: loop body
LE: loop exit
PB: predicated region body
PF: predicated region fallthrough
CT: control target
= control target key end

     0   :  { %10 = vsyncpa [#allocation3], 0  ;;  %s770_s0 = inlined_call_operand.hbm [shape: f32[8,128], index: 0, kind: input, shape index: {}]   ;;  %s771_s1 = inlined_call_operand.hbm [shape: f32[128,128], index: 1, kind: input, shape index: {}]   ;;  %s772_s2 = inlined_call_operand.hbm [shape: f32[128,128], index: 2, kind: input, shape index: {}]   ;;  %s773_s3 = inlined_call_operand.hbm [shape: f32[128,128], index: 3, kind: input, shape index: {}]   ;;  %s774_s4 = inlined_call_operand.vmem [shape: f32[3,128], index: 4, kind: input, shape index: {}]   ;;  %s775_s5 = inlined_call_operand.hbm [shape: f32[8,128], index: 5, kind: output, shape index: {}]  }
   0x1   :  { %11 = vsyncpa [#allocation6], 0 }
   0x2   :  { %12 = vsyncpa [#allocation9], 0 }
   0x3   :  { %13 = vsyncpa [#allocation4], 0  ;;  %s644_s18 = smov [#allocation5]  }
   0x4   :  { %s29_s19 = sshll.u32 %s644_s18, 4  ;;  %s30_s19 = int_to_ptr.vmem [resolvable:$true] %s29_s19 }
   0x5   :  { %s544_s20 = scalar_lea.vmem %s30_s19, 2048  ;;  %p549_p1 = scmp.lt.s32.totalorder %s30_s19, %s30_s19 }
   0x6   :  { %p545_p0 = scmp.ne.s32.totalorder %s30_s19, %s544_s20  ;;  %p550_p2 = scmp.lt.s32.totalorder %s544_s20, %s544_s20 }
   0x8   :  { %p551_p3 = por %p550_p2, %p549_p1 }
   0xa   :  { %p552_p4 = pnand %p551_p3, %p545_p0 }
   0xc   :  { %555 = shalt.err (!%p552_p4)
}
   0xd   :  { %s645_s21 = smov 128   ;;  %s646_s22 = smov 8  }
   0xe   :  { %35 = dma.hbm_to_vmem [thread:$0]  %s771_s1, 2048, %s30_s19, [#allocation6], %s645_s21, %s645_s21, %s646_s22  }
   0xf   :  { %s647_s25 = smov [#allocation2]   ;;  %s648_s27 = smov [#allocation7]  }
  0x10   :  { %s20_s26 = sshll.u32 %s647_s25, 4  ;;  %s41_s28 = sshll.u32 %s648_s27, 4  ;;  %s21_s26 = int_to_ptr.vmem [resolvable:$true] %s20_s26  ;;  %s42_s28 = int_to_ptr.vmem [resolvable:$true] %s41_s28 }
  0x11   :  { %s564_s29 = scalar_lea.vmem %s21_s26, 128  ;;  %p569_p6 = scmp.lt.s32.totalorder %s21_s26, %s21_s26 }
  0x12   :  { %p565_p5 = scmp.ne.s32.totalorder %s21_s26, %s564_s29  ;;  %p570_p7 = scmp.lt.s32.totalorder %s564_s29, %s564_s29 }
  0x14   :  { %p571_p8 = por %p570_p7, %p569_p6 }
  0x16   :  { %p572_p9 = pnand %p571_p8, %p565_p5 }
  0x18   :  { %575 = shalt.err (!%p572_p9)
}
  0x19   :  { %23 = dma.hbm_to_vmem [thread:$0]  %s770_s0, 128, %s21_s26, [#allocation3]  }
  0x1a   :  { %s584_s7 = scalar_lea.vmem %s42_s28, 2048  ;;  %p589_p11 = scmp.lt.s32.totalorder %s42_s28, %s42_s28 }
  0x1b   :  { %p585_p10 = scmp.ne.s32.totalorder %s42_s28, %s584_s7  ;;  %p590_p12 = scmp.lt.s32.totalorder %s584_s7, %s584_s7 }
  0x1d   :  { %p591_p13 = por %p590_p12, %p589_p11 }
  0x1f   :  { %p592_p0 = pnand %p591_p13, %p585_p10 }
  0x21   :  { %595 = shalt.err (!%p592_p0)
}
  0x22   :  { %47 = dma.hbm_to_vmem [thread:$0]  %s772_s2, 2048, %s42_s28, [#allocation6], %s645_s21, %s645_s21, %s646_s22  }
  0x23   :  { %s649_s9 = smov [#allocation8]  }
  0x24   :  { %s53_s10 = sshll.u32 %s649_s9, 4  ;;  %s54_s10 = int_to_ptr.vmem [resolvable:$true] %s53_s10 }
  0x25   :  { %s604_s11 = scalar_lea.vmem %s54_s10, 2048  ;;  %p609_p2 = scmp.lt.s32.totalorder %s54_s10, %s54_s10 }
  0x26   :  { %p605_p1 = scmp.ne.s32.totalorder %s54_s10, %s604_s11  ;;  %p610_p3 = scmp.lt.s32.totalorder %s604_s11, %s604_s11 }
  0x28   :  { %p611_p4 = por %p610_p3, %p609_p2 }
  0x2a   :  { %p612_p5 = pnand %p611_p4, %p605_p1 }
  0x2c   :  { %615 = shalt.err (!%p612_p5)
}
  0x2d   :  { %59 = dma.hbm_to_vmem [thread:$0]  %s773_s3, 2048, %s54_s10, [#allocation9], %s645_s21, %s645_s21, %s646_s22  }
  0x2e   :  { %636 = dma.done.wait [#allocation3], 128  }
  0x2f   :  { %637 = vsyncadd [#allocation3], 4294967168 }
  0x30   :  { %638 = dma.done.wait [#allocation6], 4096  }
  0x31   :  { %639 = vsyncadd [#allocation6], 4294963200 }
  0x32   :  { %640 = dma.done.wait [#allocation9], 2048  }
  0x33   :  { %641 = vsyncadd [#allocation9], 4294965248  ;;  %v650_v0 = vmov 0.0   ;;  %vm651_vm0 = vmmov 0   ;;  %v90_v1 = vld [vmem:[#allocation5 + $0x78] sm:$0xff]  ;;  %v89_v2 = vld [vmem:[#allocation5 + $0x70] sm:$0xff] }
  0x34   :  { %422 = vmatprep.subr.mxu0 %v650_v0  ;;  %454 = vmatprep.mubr.msk.f32.mxu0 %vm651_vm0, %v650_v0  ;;  %v88_v3 = vld [vmem:[#allocation5 + $0x68] sm:$0xff]  ;;  %v87_v4 = vld [vmem:[#allocation5 + $0x60] sm:$0xff]  ;;  %v182_v5 = vld [vmem:[#allocation7 + $0x78] sm:$0xff]  ;;  %s652_s17 = smov [#allocation10]  }
  0x35   :  { %457 = vmatprep.subr.mxu1 %v650_v0  ;;  %489 = vmatprep.mubr.msk.f32.mxu1 %vm651_vm0, %v650_v0  ;;  %v86_v6 = vld [vmem:[#allocation5 + $0x58] sm:$0xff]  ;;  %v181_v7 = vld [vmem:[#allocation7 + $0x70] sm:$0xff]  ;;  %v180_v8 = vld [vmem:[#allocation7 + $0x68] sm:$0xff]  ;;  %s357_s18 = sshll.u32 %s652_s17, 4  ;;  %s358_s18 = int_to_ptr.vmem [resolvable:$true] %s357_s18 }
  0x36   :  { %423 = vmatpush3.msra.mxu0 %v90_v1  ;;  %458 = vmatpush3.msra.mxu1 %v182_v5  ;;  %v85_v9 = vld [vmem:[#allocation5 + $0x50] sm:$0xff]  ;;  %v179_v10 = vld [vmem:[#allocation7 + $0x60] sm:$0xff]  ;;  %v84_v11 = vld [vmem:[#allocation5 + $0x48] sm:$0xff]  ;;  %s616_s19 = scalar_lea.vmem %s358_s18, 128  ;;  %p621_p7 = scmp.lt.s32.totalorder %s358_s18, %s358_s18 }
  0x37   :  { %424 = vmatprep.subr.mxu0 %v650_v0  ;;  %459 = vmatprep.subr.mxu1 %v650_v0  ;;  %v178_v12 = vld [vmem:[#allocation7 + $0x58] sm:$0xff]  ;;  %v83_v13 = vld [vmem:[#allocation5 + $0x40] sm:$0xff]  ;;  %v177_v14 = vld [vmem:[#allocation7 + $0x50] sm:$0xff]  ;;  %p617_p6 = scmp.ne.s32.totalorder %s358_s18, %s616_s19  ;;  %p622_p8 = scmp.lt.s32.totalorder %s616_s19, %s616_s19 }
  0x38   :  { %425 = vmatpush3.msra.mxu0 %v89_v2  ;;  %460 = vmatpush3.msra.mxu1 %v181_v7  ;;  %v82_v15 = vld [vmem:[#allocation5 + $0x38] sm:$0xff]  ;;  %v176_v16 = vld [vmem:[#allocation7 + $0x48] sm:$0xff]  ;;  %v81_v17 = vld [vmem:[#allocation5 + $0x30] sm:$0xff] }
  0x39   :  { %426 = vmatprep.subr.mxu0 %v650_v0  ;;  %461 = vmatprep.subr.mxu1 %v650_v0  ;;  %v175_v18 = vld [vmem:[#allocation7 + $0x40] sm:$0xff]  ;;  %v80_v19 = vld [vmem:[#allocation5 + $0x28] sm:$0xff]  ;;  %v174_v20 = vld [vmem:[#allocation7 + $0x38] sm:$0xff]  ;;  %p623_p9 = por %p622_p8, %p621_p7 }
  0x3a   :  { %427 = vmatpush3.msra.mxu0 %v88_v3  ;;  %462 = vmatpush3.msra.mxu1 %v180_v8  ;;  %v79_v21 = vld [vmem:[#allocation5 + $0x20] sm:$0xff]  ;;  %v173_v22 = vld [vmem:[#allocation7 + $0x30] sm:$0xff]  ;;  %v78_v23 = vld [vmem:[#allocation5 + $0x18] sm:$0xff] }
  0x3b   :  { %428 = vmatprep.subr.mxu0 %v650_v0  ;;  %463 = vmatprep.subr.mxu1 %v650_v0  ;;  %v172_v24 = vld [vmem:[#allocation7 + $0x28] sm:$0xff]  ;;  %v77_v25 = vld [vmem:[#allocation5 + $0x10] sm:$0xff]  ;;  %v171_v26 = vld [vmem:[#allocation7 + $0x20] sm:$0xff]  ;;  %p624_p10 = pnand %p623_p9, %p617_p6 }
  0x3c   :  { %429 = vmatpush3.msra.mxu0 %v87_v4  ;;  %464 = vmatpush3.msra.mxu1 %v179_v10  ;;  %v76_v27 = vld [vmem:[#allocation5 + $0x8] sm:$0xff]  ;;  %v170_v28 = vld [vmem:[#allocation7 + $0x18] sm:$0xff]  ;;  %v75_v29 = vld [vmem:[#allocation5] sm:$0xff] }
  0x3d   :  { %430 = vmatprep.subr.mxu0 %v650_v0  ;;  %465 = vmatprep.subr.mxu1 %v650_v0  ;;  %v74_v30 = vld [vmem:[#allocation2] sm:$0xff]  ;;  %v169_v31 = vld [vmem:[#allocation7 + $0x10] sm:$0xff]  ;;  %v168_v32 = vld [vmem:[#allocation7 + $0x8] sm:$0xff] }
  0x3e   :  { %431 = vmatpush3.msra.mxu0 %v86_v6  ;;  %466 = vmatpush3.msra.mxu1 %v178_v12  ;;  %v167_v33 = vld [vmem:[#allocation7] sm:$0xff]  ;;  %v274_v34 = vld [vmem:[#allocation8 + $0x78] sm:$0xff]  ;;  %v273_v35 = vld [vmem:[#allocation8 + $0x70] sm:$0xff] }
  0x3f   :  { %432 = vmatprep.subr.mxu0 %v650_v0  ;;  %467 = vmatprep.subr.mxu1 %v650_v0  ;;  %v272_v36 = vld [vmem:[#allocation8 + $0x68] sm:$0xff]  ;;  %v271_v37 = vld [vmem:[#allocation8 + $0x60] sm:$0xff]  ;;  %v270_v38 = vld [vmem:[#allocation8 + $0x58] sm:$0xff] }
  0x40   :  { %433 = vmatpush3.msra.mxu0 %v85_v9  ;;  %468 = vmatpush3.msra.mxu1 %v177_v14  ;;  %v269_v39 = vld [vmem:[#allocation8 + $0x50] sm:$0xff]  ;;  %v268_v40 = vld [vmem:[#allocation8 + $0x48] sm:$0xff]  ;;  %v267_v41 = vld [vmem:[#allocation8 + $0x40] sm:$0xff] }
  0x41   :  { %434 = vmatprep.subr.mxu0 %v650_v0  ;;  %469 = vmatprep.subr.mxu1 %v650_v0  ;;  %v266_v42 = vld [vmem:[#allocation8 + $0x38] sm:$0xff]  ;;  %v265_v43 = vld [vmem:[#allocation8 + $0x30] sm:$0xff]  ;;  %v264_v44 = vld [vmem:[#allocation8 + $0x28] sm:$0xff] }
  0x42   :  { %435 = vmatpush3.msra.mxu0 %v84_v11  ;;  %470 = vmatpush3.msra.mxu1 %v176_v16  ;;  %v263_v45 = vld [vmem:[#allocation8 + $0x20] sm:$0xff]  ;;  %v262_v46 = vld [vmem:[#allocation8 + $0x18] sm:$0xff]  ;;  %v261_v52 = vld [vmem:[#allocation8 + $0x10] sm:$0xff] }
  0x43   :  { %436 = vmatprep.subr.mxu0 %v650_v0  ;;  %471 = vmatprep.subr.mxu1 %v650_v0  ;;  %v368_v47 = vld [vmem:[%s774_s4] ss:$0 sm:$0xff]  ;;  %v260_v53 = vld [vmem:[#allocation8 + $0x8] sm:$0xff]  ;;  %v259_v54 = vld [vmem:[#allocation8] sm:$0xff] }
  0x44   :  { %437 = vmatpush3.msra.mxu0 %v83_v13  ;;  %472 = vmatpush3.msra.mxu1 %v175_v18  ;;  %v369_v55 = vld [vmem:[%s774_s4 + $0x1] ss:$0 sm:$0xff]  ;;  %v370_v60 = vld [vmem:[%s774_s4 + $0x2] ss:$0 sm:$0xff] }
  0x45   :  { %438 = vmatprep.subr.mxu0 %v650_v0  ;;  %473 = vmatprep.subr.mxu1 %v650_v0 }
  0x46   :  { %439 = vmatpush3.msra.mxu0 %v82_v15  ;;  %474 = vmatpush3.msra.mxu1 %v174_v20 }
  0x47   :  { %440 = vmatprep.subr.mxu0 %v650_v0  ;;  %475 = vmatprep.subr.mxu1 %v650_v0 }
  0x48   :  { %441 = vmatpush3.msra.mxu0 %v81_v17  ;;  %476 = vmatpush3.msra.mxu1 %v173_v22 }
  0x49   :  { %442 = vmatprep.subr.mxu0 %v650_v0  ;;  %477 = vmatprep.subr.mxu1 %v650_v0 }
  0x4a   :  { %443 = vmatpush3.msra.mxu0 %v80_v19  ;;  %478 = vmatpush3.msra.mxu1 %v172_v24 }
  0x4b   :  { %444 = vmatprep.subr.mxu0 %v650_v0  ;;  %479 = vmatprep.subr.mxu1 %v650_v0 }
  0x4c   :  { %445 = vmatpush3.msra.mxu0 %v79_v21  ;;  %480 = vmatpush3.msra.mxu1 %v171_v26 }
  0x4d   :  { %446 = vmatprep.subr.mxu0 %v650_v0  ;;  %481 = vmatprep.subr.mxu1 %v650_v0 }
  0x4e   :  { %447 = vmatpush3.msra.mxu0 %v78_v23  ;;  %482 = vmatpush3.msra.mxu1 %v170_v28 }
  0x4f   :  { %448 = vmatprep.subr.mxu0 %v650_v0  ;;  %483 = vmatprep.subr.mxu1 %v650_v0 }
  0x50   :  { %449 = vmatpush3.msra.mxu0 %v77_v25  ;;  %484 = vmatpush3.msra.mxu1 %v169_v31 }
  0x51   :  { %450 = vmatprep.subr.mxu0 %v650_v0  ;;  %485 = vmatprep.subr.mxu1 %v650_v0 }
  0x52   :  { %451 = vmatpush3.msra.mxu0 %v76_v27  ;;  %486 = vmatpush3.msra.mxu1 %v168_v32 }
  0x53   :  { %452 = vmatprep.subr.mxu0 %v650_v0  ;;  %487 = vmatprep.subr.mxu1 %v650_v0 }
  0x54   :  { %453 = vmatpush3.msra.mxu0 %v75_v29  ;;  %488 = vmatpush3.msra.mxu1 %v167_v33 }
  0x55   :  { %455 = vmatmul.mubr.f32.vlgmr.msra.gmra.mxu0 %v74_v30  ;;  %492 = vmatprep.subr.mxu0 %v650_v0 }
  0x56   :  { %524 = vmatprep.mubr.msk.f32.mxu0 %vm651_vm0, %v650_v0  ;;  %493 = vmatpush3.msra.mxu0 %v274_v34 }
  0x57   :  { %494 = vmatprep.subr.mxu0 %v650_v0 }
  0x58   :  { %495 = vmatpush3.msra.mxu0 %v273_v35 }
  0x59   :  { %496 = vmatprep.subr.mxu0 %v650_v0 }
  0x5a   :  { %497 = vmatpush3.msra.mxu0 %v272_v36 }
  0x5b   :  { %498 = vmatprep.subr.mxu0 %v650_v0 }
  0x5c   :  { %499 = vmatpush3.msra.mxu0 %v271_v37 }
  0x5d   :  { %500 = vmatprep.subr.mxu0 %v650_v0 }
  0x5e   :  { %501 = vmatpush3.msra.mxu0 %v270_v38 }
  0x5f   :  { %502 = vmatprep.subr.mxu0 %v650_v0 }
  0x60   :  { %503 = vmatpush3.msra.mxu0 %v269_v39 }
  0x61   :  { %504 = vmatprep.subr.mxu0 %v650_v0 }
  0x62   :  { %505 = vmatpush3.msra.mxu0 %v268_v40 }
  0x63   :  { %506 = vmatprep.subr.mxu0 %v650_v0 }
  0x64   :  { %507 = vmatpush3.msra.mxu0 %v267_v41 }
  0x65   :  { %508 = vmatprep.subr.mxu0 %v650_v0 }
  0x66   :  { %509 = vmatpush3.msra.mxu0 %v266_v42 }
  0x67   :  { %510 = vmatprep.subr.mxu0 %v650_v0 }
  0x68   :  { %511 = vmatpush3.msra.mxu0 %v265_v43 }
  0x69   :  { %512 = vmatprep.subr.mxu0 %v650_v0 }
  0x6a   :  { %513 = vmatpush3.msra.mxu0 %v264_v44 }
  0x6b   :  { %514 = vmatprep.subr.mxu0 %v650_v0 }
  0x6c   :  { %515 = vmatpush3.msra.mxu0 %v263_v45 }
  0x6d   :  { %516 = vmatprep.subr.mxu0 %v650_v0 }
  0x6e   :  { %517 = vmatpush3.msra.mxu0 %v262_v46 }
  0x6f   :  { %518 = vmatprep.subr.mxu0 %v650_v0 }
  0x70   :  { %519 = vmatpush3.msra.mxu0 %v261_v52 }
  0x71   :  { %520 = vmatprep.subr.mxu0 %v650_v0 }
  0x72   :  { %521 = vmatpush3.msra.mxu0 %v260_v53 }
  0x73   :  { %522 = vmatprep.subr.mxu0 %v650_v0 }
  0x74   :  { %523 = vmatpush3.msra.mxu0 %v259_v54 }
 0x115   :  { %v162_v48 = vpop.f32.mrf.mxu0 }
 0x116   :  { %v163_v49 = vadd.f32 %v368_v47, %v162_v48 }
 0x117   :  { %v456_v50 = vpop.f32.mrf.mxu0 }
 0x118   :  { %v166_v51 = vmax.f32 %v163_v49, 0.0 }
 0x11a   :  { %490 = vmatmul.mubr.f32.vlgmr.msra.gmra.mxu1 %v166_v51 }
 0x1da   :  { %v254_v56 = vpop.f32.mrf.mxu1 }
 0x1db   :  { %v255_v57 = vadd.f32 %v369_v55, %v254_v56 }
 0x1dc   :  { %v491_v58 = vpop.f32.mrf.mxu1 }
 0x1dd   :  { %v258_v59 = vmax.f32 %v255_v57, 0.0 }
 0x1df   :  { %525 = vmatmul.mubr.f32.vlgmr.msra.gmra.mxu0 %v258_v59 }
 0x29f   :  { %v346_v61 = vpop.f32.mrf.mxu0 }
 0x2a0   :  { %v347_v62 = vadd.f32 %v370_v60, %v346_v61 }
 0x2a1   :  { %v526_v63 = vpop.f32.mrf.mxu0 }
 0x2a2   :  { %350 = vst [vmem:[#allocation10] sm:$0xff] %v347_v62 }
 0x2a3   :  { %627 = shalt.err (!%p624_p10)
}
 0x2a4   :  { %360 = dma.vmem_to_hbm [thread:$0]  %s358_s18, 128, %s775_s5, [#allocation4]  }
 0x2a5   :  { %642 = dma.done.wait [#allocation4], 128  }
 0x2a6   :  { %643 = vsyncadd [#allocation4], 4294967168 }
 0x2a7   :  { %364 = vsyncpa [#allocation3], 1 }
 0x2a8   :  { %365 = vsyncpa [#allocation6], 1 }
 0x2a9   :  { %366 = vsyncpa [#allocation9], 1 }
 0x2aa   :  { %367 = vsyncpa [#allocation4], 1 }

// kernel: tpu_custom_call.1
= control target key start
LH: loop header
LB: loop body
LE: loop exit
PB: predicated region body
PF: predicated region fallthrough
CT: control target
= control target key end

     0   :  { %10 = vsyncpa [#allocation3], 0  ;;  %s770_s0 = inlined_call_operand.hbm [shape: f32[8,128], index: 0, kind: input, shape index: {}]   ;;  %s771_s1 = inlined_call_operand.hbm [shape: f32[128,128], index: 1, kind: input, shape index: {}]   ;;  %s772_s2 = inlined_call_operand.hbm [shape: f32[128,128], index: 2, kind: input, shape index: {}]   ;;  %s773_s3 = inlined_call_operand.hbm [shape: f32[128,128], index: 3, kind: input, shape index: {}]   ;;  %s774_s4 = inlined_call_operand.vmem [shape: f32[3,128], index: 4, kind: input, shape index: {}]   ;;  %s775_s5 = inlined_call_operand.hbm [shape: f32[8,128], index: 5, kind: output, shape index: {}]  }
   0x1   :  { %11 = vsyncpa [#allocation6], 0 }
   0x2   :  { %12 = vsyncpa [#allocation9], 0 }
   0x3   :  { %13 = vsyncpa [#allocation4], 0  ;;  %s644_s18 = smov [#allocation5]  }
   0x4   :  { %s29_s19 = sshll.u32 %s644_s18, 4  ;;  %s30_s19 = int_to_ptr.vmem [resolvable:$true] %s29_s19 }
   0x5   :  { %s544_s20 = scalar_lea.vmem %s30_s19, 2048  ;;  %p549_p1 = scmp.lt.s32.totalorder %s30_s19, %s30_s19 }
   0x6   :  { %p545_p0 = scmp.ne.s32.totalorder %s30_s19, %s544_s20  ;;  %p550_p2 = scmp.lt.s32.totalorder %s544_s20, %s544_s20 }
   0x8   :  { %p551_p3 = por %p550_p2, %p549_p1 }
   0xa   :  { %p552_p4 = pnand %p551_p3, %p545_p0 }
   0xc   :  { %555 = shalt.err (!%p552_p4)
}
   0xd   :  { %s645_s21 = smov 128   ;;  %s646_s22 = smov 8  }
   0xe   :  { %35 = dma.hbm_to_vmem [thread:$0]  %s771_s1, 2048, %s30_s19, [#allocation6], %s645_s21, %s645_s21, %s646_s22  }
   0xf   :  { %s647_s25 = smov [#allocation2]   ;;  %s648_s27 = smov [#allocation7]  }
  0x10   :  { %s20_s26 = sshll.u32 %s647_s25, 4  ;;  %s41_s28 = sshll.u32 %s648_s27, 4  ;;  %s21_s26 = int_to_ptr.vmem [resolvable:$true] %s20_s26  ;;  %s42_s28 = int_to_ptr.vmem [resolvable:$true] %s41_s28 }
  0x11   :  { %s564_s29 = scalar_lea.vmem %s21_s26, 128  ;;  %p569_p6 = scmp.lt.s32.totalorder %s21_s26, %s21_s26 }
  0x12   :  { %p565_p5 = scmp.ne.s32.totalorder %s21_s26, %s564_s29  ;;  %p570_p7 = scmp.lt.s32.totalorder %s564_s29, %s564_s29 }
  0x14   :  { %p571_p8 = por %p570_p7, %p569_p6 }
  0x16   :  { %p572_p9 = pnand %p571_p8, %p565_p5 }
  0x18   :  { %575 = shalt.err (!%p572_p9)
}
  0x19   :  { %23 = dma.hbm_to_vmem [thread:$0]  %s770_s0, 128, %s21_s26, [#allocation3]  }
  0x1a   :  { %s584_s7 = scalar_lea.vmem %s42_s28, 2048  ;;  %p589_p11 = scmp.lt.s32.totalorder %s42_s28, %s42_s28 }
  0x1b   :  { %p585_p10 = scmp.ne.s32.totalorder %s42_s28, %s584_s7  ;;  %p590_p12 = scmp.lt.s32.totalorder %s584_s7, %s584_s7 }
  0x1d   :  { %p591_p13 = por %p590_p12, %p589_p11 }
  0x1f   :  { %p592_p0 = pnand %p591_p13, %p585_p10 }
  0x21   :  { %595 = shalt.err (!%p592_p0)
}
  0x22   :  { %47 = dma.hbm_to_vmem [thread:$0]  %s772_s2, 2048, %s42_s28, [#allocation6], %s645_s21, %s645_s21, %s646_s22  }
  0x23   :  { %s649_s9 = smov [#allocation8]  }
  0x24   :  { %s53_s10 = sshll.u32 %s649_s9, 4  ;;  %s54_s10 = int_to_ptr.vmem [resolvable:$true] %s53_s10 }
  0x25   :  { %s604_s11 = scalar_lea.vmem %s54_s10, 2048  ;;  %p609_p2 = scmp.lt.s32.totalorder %s54_s10, %s54_s10 }
  0x26   :  { %p605_p1 = scmp.ne.s32.totalorder %s54_s10, %s604_s11  ;;  %p610_p3 = scmp.lt.s32.totalorder %s604_s11, %s604_s11 }
  0x28   :  { %p611_p4 = por %p610_p3, %p609_p2 }
  0x2a   :  { %p612_p5 = pnand %p611_p4, %p605_p1 }
  0x2c   :  { %615 = shalt.err (!%p612_p5)
}
  0x2d   :  { %59 = dma.hbm_to_vmem [thread:$0]  %s773_s3, 2048, %s54_s10, [#allocation9], %s645_s21, %s645_s21, %s646_s22  }
  0x2e   :  { %636 = dma.done.wait [#allocation3], 128  }
  0x2f   :  { %637 = vsyncadd [#allocation3], 4294967168 }
  0x30   :  { %638 = dma.done.wait [#allocation6], 4096  }
  0x31   :  { %639 = vsyncadd [#allocation6], 4294963200 }
  0x32   :  { %640 = dma.done.wait [#allocation9], 2048  }
  0x33   :  { %641 = vsyncadd [#allocation9], 4294965248  ;;  %v650_v0 = vmov 0.0   ;;  %vm651_vm0 = vmmov 0   ;;  %v90_v1 = vld [vmem:[#allocation5 + $0x78] sm:$0xff]  ;;  %v89_v2 = vld [vmem:[#allocation5 + $0x70] sm:$0xff] }
  0x34   :  { %422 = vmatprep.subr.mxu0 %v650_v0  ;;  %454 = vmatprep.mubr.msk.f32.mxu0 %vm651_vm0, %v650_v0  ;;  %v88_v3 = vld [vmem:[#allocation5 + $0x68] sm:$0xff]  ;;  %v87_v4 = vld [vmem:[#allocation5 + $0x60] sm:$0xff]  ;;  %v182_v5 = vld [vmem:[#allocation7 + $0x78] sm:$0xff]  ;;  %s652_s17 = smov [#allocation10]  }
  0x35   :  { %457 = vmatprep.subr.mxu1 %v650_v0  ;;  %489 = vmatprep.mubr.msk.f32.mxu1 %vm651_vm0, %v650_v0  ;;  %v86_v6 = vld [vmem:[#allocation5 + $0x58] sm:$0xff]  ;;  %v181_v7 = vld [vmem:[#allocation7 + $0x70] sm:$0xff]  ;;  %v180_v8 = vld [vmem:[#allocation7 + $0x68] sm:$0xff]  ;;  %s357_s18 = sshll.u32 %s652_s17, 4  ;;  %s358_s18 = int_to_ptr.vmem [resolvable:$true] %s357_s18 }
  0x36   :  { %423 = vmatpush3.msra.mxu0 %v90_v1  ;;  %458 = vmatpush3.msra.mxu1 %v182_v5  ;;  %v85_v9 = vld [vmem:[#allocation5 + $0x50] sm:$0xff]  ;;  %v179_v10 = vld [vmem:[#allocation7 + $0x60] sm:$0xff]  ;;  %v84_v11 = vld [vmem:[#allocation5 + $0x48] sm:$0xff]  ;;  %s616_s19 = scalar_lea.vmem %s358_s18, 128  ;;  %p621_p7 = scmp.lt.s32.totalorder %s358_s18, %s358_s18 }
  0x37   :  { %424 = vmatprep.subr.mxu0 %v650_v0  ;;  %459 = vmatprep.subr.mxu1 %v650_v0  ;;  %v178_v12 = vld [vmem:[#allocation7 + $0x58] sm:$0xff]  ;;  %v83_v13 = vld [vmem:[#allocation5 + $0x40] sm:$0xff]  ;;  %v177_v14 = vld [vmem:[#allocation7 + $0x50] sm:$0xff]  ;;  %p617_p6 = scmp.ne.s32.totalorder %s358_s18, %s616_s19  ;;  %p622_p8 = scmp.lt.s32.totalorder %s616_s19, %s616_s19 }
  0x38   :  { %425 = vmatpush3.msra.mxu0 %v89_v2  ;;  %460 = vmatpush3.msra.mxu1 %v181_v7  ;;  %v82_v15 = vld [vmem:[#allocation5 + $0x38] sm:$0xff]  ;;  %v176_v16 = vld [vmem:[#allocation7 + $0x48] sm:$0xff]  ;;  %v81_v17 = vld [vmem:[#allocation5 + $0x30] sm:$0xff] }
  0x39   :  { %426 = vmatprep.subr.mxu0 %v650_v0  ;;  %461 = vmatprep.subr.mxu1 %v650_v0  ;;  %v175_v18 = vld [vmem:[#allocation7 + $0x40] sm:$0xff]  ;;  %v80_v19 = vld [vmem:[#allocation5 + $0x28] sm:$0xff]  ;;  %v174_v20 = vld [vmem:[#allocation7 + $0x38] sm:$0xff]  ;;  %p623_p9 = por %p622_p8, %p621_p7 }
  0x3a   :  { %427 = vmatpush3.msra.mxu0 %v88_v3  ;;  %462 = vmatpush3.msra.mxu1 %v180_v8  ;;  %v79_v21 = vld [vmem:[#allocation5 + $0x20] sm:$0xff]  ;;  %v173_v22 = vld [vmem:[#allocation7 + $0x30] sm:$0xff]  ;;  %v78_v23 = vld [vmem:[#allocation5 + $0x18] sm:$0xff] }
  0x3b   :  { %428 = vmatprep.subr.mxu0 %v650_v0  ;;  %463 = vmatprep.subr.mxu1 %v650_v0  ;;  %v172_v24 = vld [vmem:[#allocation7 + $0x28] sm:$0xff]  ;;  %v77_v25 = vld [vmem:[#allocation5 + $0x10] sm:$0xff]  ;;  %v171_v26 = vld [vmem:[#allocation7 + $0x20] sm:$0xff]  ;;  %p624_p10 = pnand %p623_p9, %p617_p6 }
  0x3c   :  { %429 = vmatpush3.msra.mxu0 %v87_v4  ;;  %464 = vmatpush3.msra.mxu1 %v179_v10  ;;  %v76_v27 = vld [vmem:[#allocation5 + $0x8] sm:$0xff]  ;;  %v170_v28 = vld [vmem:[#allocation7 + $0x18] sm:$0xff]  ;;  %v75_v29 = vld [vmem:[#allocation5] sm:$0xff] }
  0x3d   :  { %430 = vmatprep.subr.mxu0 %v650_v0  ;;  %465 = vmatprep.subr.mxu1 %v650_v0  ;;  %v74_v30 = vld [vmem:[#allocation2] sm:$0xff]  ;;  %v169_v31 = vld [vmem:[#allocation7 + $0x10] sm:$0xff]  ;;  %v168_v32 = vld [vmem:[#allocation7 + $0x8] sm:$0xff] }
  0x3e   :  { %431 = vmatpush3.msra.mxu0 %v86_v6  ;;  %466 = vmatpush3.msra.mxu1 %v178_v12  ;;  %v167_v33 = vld [vmem:[#allocation7] sm:$0xff]  ;;  %v274_v34 = vld [vmem:[#allocation8 + $0x78] sm:$0xff]  ;;  %v273_v35 = vld [vmem:[#allocation8 + $0x70] sm:$0xff] }
  0x3f   :  { %432 = vmatprep.subr.mxu0 %v650_v0  ;;  %467 = vmatprep.subr.mxu1 %v650_v0  ;;  %v272_v36 = vld [vmem:[#allocation8 + $0x68] sm:$0xff]  ;;  %v271_v37 = vld [vmem:[#allocation8 + $0x60] sm:$0xff]  ;;  %v270_v38 = vld [vmem:[#allocation8 + $0x58] sm:$0xff] }
  0x40   :  { %433 = vmatpush3.msra.mxu0 %v85_v9  ;;  %468 = vmatpush3.msra.mxu1 %v177_v14  ;;  %v269_v39 = vld [vmem:[#allocation8 + $0x50] sm:$0xff]  ;;  %v268_v40 = vld [vmem:[#allocation8 + $0x48] sm:$0xff]  ;;  %v267_v41 = vld [vmem:[#allocation8 + $0x40] sm:$0xff] }
  0x41   :  { %434 = vmatprep.subr.mxu0 %v650_v0  ;;  %469 = vmatprep.subr.mxu1 %v650_v0  ;;  %v266_v42 = vld [vmem:[#allocation8 + $0x38] sm:$0xff]  ;;  %v265_v43 = vld [vmem:[#allocation8 + $0x30] sm:$0xff]  ;;  %v264_v44 = vld [vmem:[#allocation8 + $0x28] sm:$0xff] }
  0x42   :  { %435 = vmatpush3.msra.mxu0 %v84_v11  ;;  %470 = vmatpush3.msra.mxu1 %v176_v16  ;;  %v263_v45 = vld [vmem:[#allocation8 + $0x20] sm:$0xff]  ;;  %v262_v46 = vld [vmem:[#allocation8 + $0x18] sm:$0xff]  ;;  %v261_v52 = vld [vmem:[#allocation8 + $0x10] sm:$0xff] }
  0x43   :  { %436 = vmatprep.subr.mxu0 %v650_v0  ;;  %471 = vmatprep.subr.mxu1 %v650_v0  ;;  %v368_v47 = vld [vmem:[%s774_s4] ss:$0 sm:$0xff]  ;;  %v260_v53 = vld [vmem:[#allocation8 + $0x8] sm:$0xff]  ;;  %v259_v54 = vld [vmem:[#allocation8] sm:$0xff] }
  0x44   :  { %437 = vmatpush3.msra.mxu0 %v83_v13  ;;  %472 = vmatpush3.msra.mxu1 %v175_v18  ;;  %v369_v55 = vld [vmem:[%s774_s4 + $0x1] ss:$0 sm:$0xff]  ;;  %v370_v60 = vld [vmem:[%s774_s4 + $0x2] ss:$0 sm:$0xff] }
  0x45   :  { %438 = vmatprep.subr.mxu0 %v650_v0  ;;  %473 = vmatprep.subr.mxu1 %v650_v0 }
  0x46   :  { %439 = vmatpush3.msra.mxu0 %v82_v15  ;;  %474 = vmatpush3.msra.mxu1 %v174_v20 }
  0x47   :  { %440 = vmatprep.subr.mxu0 %v650_v0  ;;  %475 = vmatprep.subr.mxu1 %v650_v0 }
  0x48   :  { %441 = vmatpush3.msra.mxu0 %v81_v17  ;;  %476 = vmatpush3.msra.mxu1 %v173_v22 }
  0x49   :  { %442 = vmatprep.subr.mxu0 %v650_v0  ;;  %477 = vmatprep.subr.mxu1 %v650_v0 }
  0x4a   :  { %443 = vmatpush3.msra.mxu0 %v80_v19  ;;  %478 = vmatpush3.msra.mxu1 %v172_v24 }
  0x4b   :  { %444 = vmatprep.subr.mxu0 %v650_v0  ;;  %479 = vmatprep.subr.mxu1 %v650_v0 }
  0x4c   :  { %445 = vmatpush3.msra.mxu0 %v79_v21  ;;  %480 = vmatpush3.msra.mxu1 %v171_v26 }
  0x4d   :  { %446 = vmatprep.subr.mxu0 %v650_v0  ;;  %481 = vmatprep.subr.mxu1 %v650_v0 }
  0x4e   :  { %447 = vmatpush3.msra.mxu0 %v78_v23  ;;  %482 = vmatpush3.msra.mxu1 %v170_v28 }
  0x4f   :  { %448 = vmatprep.subr.mxu0 %v650_v0  ;;  %483 = vmatprep.subr.mxu1 %v650_v0 }
  0x50   :  { %449 = vmatpush3.msra.mxu0 %v77_v25  ;;  %484 = vmatpush3.msra.mxu1 %v169_v31 }
  0x51   :  { %450 = vmatprep.subr.mxu0 %v650_v0  ;;  %485 = vmatprep.subr.mxu1 %v650_v0 }
  0x52   :  { %451 = vmatpush3.msra.mxu0 %v76_v27  ;;  %486 = vmatpush3.msra.mxu1 %v168_v32 }
  0x53   :  { %452 = vmatprep.subr.mxu0 %v650_v0  ;;  %487 = vmatprep.subr.mxu1 %v650_v0 }
  0x54   :  { %453 = vmatpush3.msra.mxu0 %v75_v29  ;;  %488 = vmatpush3.msra.mxu1 %v167_v33 }
  0x55   :  { %455 = vmatmul.mubr.f32.vlgmr.msra.gmra.mxu0 %v74_v30  ;;  %492 = vmatprep.subr.mxu0 %v650_v0 }
  0x56   :  { %524 = vmatprep.mubr.msk.f32.mxu0 %vm651_vm0, %v650_v0  ;;  %493 = vmatpush3.msra.mxu0 %v274_v34 }
  0x57   :  { %494 = vmatprep.subr.mxu0 %v650_v0 }
  0x58   :  { %495 = vmatpush3.msra.mxu0 %v273_v35 }
  0x59   :  { %496 = vmatprep.subr.mxu0 %v650_v0 }
  0x5a   :  { %497 = vmatpush3.msra.mxu0 %v272_v36 }
  0x5b   :  { %498 = vmatprep.subr.mxu0 %v650_v0 }
  0x5c   :  { %499 = vmatpush3.msra.mxu0 %v271_v37 }
  0x5d   :  { %500 = vmatprep.subr.mxu0 %v650_v0 }
  0x5e   :  { %501 = vmatpush3.msra.mxu0 %v270_v38 }
  0x5f   :  { %502 = vmatprep.subr.mxu0 %v650_v0 }
  0x60   :  { %503 = vmatpush3.msra.mxu0 %v269_v39 }
  0x61   :  { %504 = vmatprep.subr.mxu0 %v650_v0 }
  0x62   :  { %505 = vmatpush3.msra.mxu0 %v268_v40 }
  0x63   :  { %506 = vmatprep.subr.mxu0 %v650_v0 }
  0x64   :  { %507 = vmatpush3.msra.mxu0 %v267_v41 }
  0x65   :  { %508 = vmatprep.subr.mxu0 %v650_v0 }
  0x66   :  { %509 = vmatpush3.msra.mxu0 %v266_v42 }
  0x67   :  { %510 = vmatprep.subr.mxu0 %v650_v0 }
  0x68   :  { %511 = vmatpush3.msra.mxu0 %v265_v43 }
  0x69   :  { %512 = vmatprep.subr.mxu0 %v650_v0 }
  0x6a   :  { %513 = vmatpush3.msra.mxu0 %v264_v44 }
  0x6b   :  { %514 = vmatprep.subr.mxu0 %v650_v0 }
  0x6c   :  { %515 = vmatpush3.msra.mxu0 %v263_v45 }
  0x6d   :  { %516 = vmatprep.subr.mxu0 %v650_v0 }
  0x6e   :  { %517 = vmatpush3.msra.mxu0 %v262_v46 }
  0x6f   :  { %518 = vmatprep.subr.mxu0 %v650_v0 }
  0x70   :  { %519 = vmatpush3.msra.mxu0 %v261_v52 }
  0x71   :  { %520 = vmatprep.subr.mxu0 %v650_v0 }
  0x72   :  { %521 = vmatpush3.msra.mxu0 %v260_v53 }
  0x73   :  { %522 = vmatprep.subr.mxu0 %v650_v0 }
  0x74   :  { %523 = vmatpush3.msra.mxu0 %v259_v54 }
 0x115   :  { %v162_v48 = vpop.f32.mrf.mxu0 }
 0x116   :  { %v163_v49 = vadd.f32 %v368_v47, %v162_v48 }
 0x117   :  { %v456_v50 = vpop.f32.mrf.mxu0 }
 0x118   :  { %v166_v51 = vmax.f32 %v163_v49, 0.0 }
 0x11a   :  { %490 = vmatmul.mubr.f32.vlgmr.msra.gmra.mxu1 %v166_v51 }
 0x1da   :  { %v254_v56 = vpop.f32.mrf.mxu1 }
 0x1db   :  { %v255_v57 = vadd.f32 %v369_v55, %v254_v56 }
 0x1dc   :  { %v491_v58 = vpop.f32.mrf.mxu1 }
 0x1dd   :  { %v258_v59 = vmax.f32 %v255_v57, 0.0 }
 0x1df   :  { %525 = vmatmul.mubr.f32.vlgmr.msra.gmra.mxu0 %v258_v59 }
 0x29f   :  { %v346_v61 = vpop.f32.mrf.mxu0 }
 0x2a0   :  { %v347_v62 = vadd.f32 %v370_v60, %v346_v61 }
 0x2a1   :  { %v526_v63 = vpop.f32.mrf.mxu0 }
 0x2a2   :  { %350 = vst [vmem:[#allocation10] sm:$0xff] %v347_v62 }
 0x2a3   :  { %627 = shalt.err (!%p624_p10)
}
 0x2a4   :  { %360 = dma.vmem_to_hbm [thread:$0]  %s358_s18, 128, %s775_s5, [#allocation4]  }
 0x2a5   :  { %642 = dma.done.wait [#allocation4], 128  }
 0x2a6   :  { %643 = vsyncadd [#allocation4], 4294967168 }
 0x2a7   :  { %364 = vsyncpa [#allocation3], 1 }
 0x2a8   :  { %365 = vsyncpa [#allocation6], 1 }
 0x2a9   :  { %366 = vsyncpa [#allocation9], 1 }
 0x2aa   :  { %367 = vsyncpa [#allocation4], 1 }

</bundles_post_ra>
